<compile_context>
chip_gen: v7x
topology: tpu7x:2x2x1
jax: 0.10.0
libtpu: 0.0.40
codegen_flags: <defaults>
</compile_context>

<pallas_src>
import functools

import jax
import jax.numpy as jnp
from jax import lax
from jax.experimental import pallas as pl
from jax.experimental.pallas import tpu as pltpu


def _center_loss_kernel(lbl_smem, x_ref, c_hbm, out_ref, c_buf, copy_sem,
                        *, block_rows):
    i = pl.program_id(0)
    base = i * block_rows

    # --- Gather the needed center rows: centers[labels[base + b]] -> c_buf[b].
    def _issue(b, carry):
        cls = lbl_smem[base + b]
        pltpu.make_async_copy(c_hbm.at[cls], c_buf.at[b], copy_sem).start()
        return carry

    lax.fori_loop(0, block_rows, _issue, 0)

    # Drain: every row copy has the same shape, so wait once per issued copy
    # with a same-shaped descriptor on the shared semaphore.
    def _drain(b, carry):
        pltpu.make_async_copy(c_hbm.at[0], c_buf.at[0], copy_sem).wait()
        return carry

    lax.fori_loop(0, block_rows, _drain, 0)

    # --- Per-row squared distance on the VPU in f32, single fused reduction.
    x = x_ref[...].astype(jnp.float32)                 # (TB, D)
    c = c_buf[...].astype(jnp.float32)                 # (TB, D)
    diff = x - c
    d = jnp.sum(diff * diff, axis=1, keepdims=True)    # (TB, 1)
    d = jnp.clip(d, 1e-12, 1e12)                       # reference per-entry clamp

    # Lane-dense per-tile partial sum; final tiny reduce happens in the wrapper.
    part = jnp.sum(d)
    out_ref[...] = jnp.broadcast_to(part, out_ref.shape)


def _pick_block_rows(batch, feat_dim, x_itemsize, c_itemsize, requested=None):
    """Largest divisor of `batch` that respects sublane packing and VMEM budget."""
    # Sublane packing: f32 rows align to 8, bf16/f16 to 16, 8-bit types to 32.
    row_align = 8 if x_itemsize >= 4 else (16 if x_itemsize == 2 else 32)
    # Per-row VMEM: double-buffered x tile + gathered-centers scratch.
    per_row = 2 * feat_dim * x_itemsize + feat_dim * c_itemsize
    budget = 16 << 20                       # conservative across v5e/v6e/v7x
    cap = max(row_align, budget // max(per_row, 1))
    cap = min(cap, batch)
    if requested is not None:
        cap = min(cap, max(int(requested), 1))
    for tb in range(int(cap), 0, -1):
        if batch % tb == 0 and tb % row_align == 0:
            return tb
    # Tiny / oddly-sized batch: a single full block is the only legal tiling.
    return batch


def center_loss(x, centers, labels, *, block_rows=None):
    """x: (B, D) float, centers: (C, D) float, labels: (B,) int -> scalar f32."""
    B, D = x.shape
    C, Dc = centers.shape
    assert D == Dc, (D, Dc)
    labels1d = labels.astype(jnp.int32).reshape(B)

    tb = _pick_block_rows(B, D, x.dtype.itemsize, centers.dtype.itemsize,
                          block_rows)
    grid = (B // tb,)

    # VMEM: double-buffered (tb, D) x tiles + gathered centers + output tiles.
    est = (2 * tb * D * x.dtype.itemsize
           + tb * D * centers.dtype.itemsize
           + 2 * 8 * 128 * 4)
    vmem_limit = int(min(max(2 * est + (4 << 20), 32 << 20), 56 << 20))

    kernel = functools.partial(_center_loss_kernel, block_rows=tb)

    partials = pl.pallas_call(
        kernel,
        out_shape=jax.ShapeDtypeStruct((grid[0], 8, 128), jnp.float32),
        grid_spec=pltpu.PrefetchScalarGridSpec(
            num_scalar_prefetch=1,                            # labels -> SMEM
            grid=grid,
            in_specs=[
                pl.BlockSpec((tb, D), lambda i, lbl: (i, 0)),  # x tiles
                pl.BlockSpec(memory_space=pl.ANY),             # centers in HBM
            ],
            out_specs=pl.BlockSpec((1, 8, 128), lambda i, lbl: (i, 0, 0)),
            scratch_shapes=[
                pltpu.VMEM((tb, D), centers.dtype),            # gathered rows
                pltpu.SemaphoreType.DMA(()),                   # shared row-DMA sem
            ],
        ),
        compiler_params=pltpu.CompilerParams(
            dimension_semantics=("parallel",),   # shardable across TensorCores
            vmem_limit_bytes=vmem_limit,
        ),
    )(labels1d, x, centers)

    # Final tiny reduction + /B + the reference's (C-1) masked-zero clamps.
    loss = jnp.sum(partials[:, 0, 0]) / B + float(C - 1) * 1e-12
    return loss.astype(jnp.float32)


def center_loss_ref(x, centers, labels):
    """Pure-JAX reference mirroring the PyTorch forward."""
    B = x.shape[0]
    C = centers.shape[0]
    distmat = (jnp.sum(x**2, axis=1, keepdims=True)
               + jnp.sum(centers**2, axis=1)[None, :]
               - 2.0 * x @ centers.T)
    mask = (labels[:, None] == jnp.arange(C)[None, :]).astype(jnp.float32)
    dist = jnp.clip(distmat * mask, 1e-12, 1e12)
    return jnp.sum(dist) / B


if __name__ == "__main__":
    num_classes = 10
    feat_dim = 32
    batch = 32

    key = jax.random.PRNGKey(0)
    k_x, k_c, k_l = jax.random.split(key, 3)

    x = jax.random.normal(k_x, (batch, feat_dim), dtype=jnp.float32)
    # Deterministic in-script init for the nn.Parameter `centers`
    # (torch.randn(num_classes, feat_dim) equivalent).
    centers = jax.random.normal(k_c, (num_classes, feat_dim), dtype=jnp.float32)
    labels = jax.random.randint(k_l, (batch,), 0, num_classes, dtype=jnp.int32)

    # block_rows=8 (test-only) exercises a 4-step grid / multi-tile gather path.
    loss = center_loss(x, centers, labels, block_rows=8)
    loss = jax.block_until_ready(loss)

    ref = center_loss_ref(x, centers, labels)
    assert jnp.allclose(loss, ref, rtol=1e-5, atol=1e-5), (loss, ref)

    print("KERNEL_OK")
</pallas_src>

<mosaic_0001>
module attributes {stable_mosaic.version = 11 : i64} {
  func.func @_center_loss_kernel(%arg0: i32, %arg1: memref<32xi32, #tpu.memory_space<smem>>, %arg2: memref<8x32xf32, #tpu.memory_space<vmem>>, %arg3: memref<10x32xf32, #tpu.memory_space<any>>, %arg4: memref<1x8x128xf32, #tpu.memory_space<vmem>>, %arg5: memref<8x32xf32, #tpu.memory_space<vmem>>, %arg6: memref<!tpu.dma_semaphore, #tpu.memory_space<semaphore_mem>>) attributes {dimension_semantics = [#tpu.dimension_semantics<parallel>], iteration_bounds = array<i64: 4>, scalar_prefetch = 1 : i64, scratch_operands = 2 : i64, tpu.core_type = #tpu.core_type<tc>, window_params = [{transform_indices = @transform_0, window_bounds = array<i64: 8, 32>}, {}, {transform_indices = @transform_2, window_bounds = array<i64: 1, 8, 128>}]} {
    %c8_i32 = arith.constant 8 : i32
    %0 = arith.muli %arg0, %c8_i32 : i32
    %c0_i32 = arith.constant 0 : i32
    %c8_i32_0 = arith.constant 8 : i32
    %1 = arith.addi %c0_i32, %c8_i32_0 : i32
    %c1_i32 = arith.constant 1 : i32
    scf.for %arg7 = %c0_i32 to %1 step %c1_i32  : i32 {
      %19 = arith.addi %0, %arg7 : i32
      %20 = arith.index_cast %19 : i32 to index
      %21 = memref.load %arg1[%20] : memref<32xi32, #tpu.memory_space<smem>>
      %c0_i32_14 = arith.constant 0 : i32
      %22 = tpu.memref_slice %arg3[%21, %c0_i32_14] : memref<10x32xf32, #tpu.memory_space<any>> -> memref<1x32xf32, #tpu.memory_space<any>>
      %23 = tpu.memref_squeeze %22 : memref<1x32xf32, #tpu.memory_space<any>> -> memref<32xf32, #tpu.memory_space<any>>
      %c0_i32_15 = arith.constant 0 : i32
      %24 = tpu.memref_slice %arg5[%arg7, %c0_i32_15] : memref<8x32xf32, #tpu.memory_space<vmem>> -> memref<1x32xf32, #tpu.memory_space<vmem>>
      %25 = tpu.memref_squeeze %24 : memref<1x32xf32, #tpu.memory_space<vmem>> -> memref<32xf32, #tpu.memory_space<vmem>>
      tpu.enqueue_dma source(%23 : memref<32xf32, #tpu.memory_space<any>>) target(%25 : memref<32xf32, #tpu.memory_space<vmem>>) target_semaphore(%arg6 : memref<!tpu.dma_semaphore, #tpu.memory_space<semaphore_mem>>)
    }
    %c8_i32_1 = arith.constant 8 : i32
    %c0_i32_2 = arith.constant 0 : i32
    %c8_i32_3 = arith.constant 8 : i32
    %2 = arith.addi %c0_i32_2, %c8_i32_3 : i32
    %c1_i32_4 = arith.constant 1 : i32
    scf.for %arg7 = %c0_i32_2 to %2 step %c1_i32_4  : i32 {
      %c0_i32_14 = arith.constant 0 : i32
      %c0_i32_15 = arith.constant 0 : i32
      %c0_i32_16 = arith.constant 0 : i32
      %19 = tpu.memref_slice %arg3[%c0_i32_14, %c0_i32_16] : memref<10x32xf32, #tpu.memory_space<any>> -> memref<1x32xf32, #tpu.memory_space<any>>
      %20 = tpu.memref_squeeze %19 : memref<1x32xf32, #tpu.memory_space<any>> -> memref<32xf32, #tpu.memory_space<any>>
      %c0_i32_17 = arith.constant 0 : i32
      %21 = tpu.memref_slice %arg5[%c0_i32_15, %c0_i32_17] : memref<8x32xf32, #tpu.memory_space<vmem>> -> memref<1x32xf32, #tpu.memory_space<vmem>>
      %22 = tpu.memref_squeeze %21 : memref<1x32xf32, #tpu.memory_space<vmem>> -> memref<32xf32, #tpu.memory_space<vmem>>
      tpu.wait_dma2 semaphore(%arg6 : memref<!tpu.dma_semaphore, #tpu.memory_space<semaphore_mem>>) src(%20 : memref<32xf32, #tpu.memory_space<any>>) dst(%22 : memref<32xf32, #tpu.memory_space<vmem>>)
    }
    %c0 = arith.constant 0 : index
    %c0_5 = arith.constant 0 : index
    %3 = vector.load %arg2[%c0, %c0_5] : memref<8x32xf32, #tpu.memory_space<vmem>>, vector<8x32xf32>
    %c0_6 = arith.constant 0 : index
    %c0_7 = arith.constant 0 : index
    %4 = vector.load %arg5[%c0_6, %c0_7] : memref<8x32xf32, #tpu.memory_space<vmem>>, vector<8x32xf32>
    %5 = arith.subf %3, %4 : vector<8x32xf32>
    %6 = arith.mulf %5, %5 : vector<8x32xf32>
    %cst = arith.constant dense<0.000000e+00> : vector<8xf32>
    %7 = vector.multi_reduction <add>, %6, %cst [1] : vector<8x32xf32> to vector<8xf32>
    %8 = vector.shape_cast %7 : vector<8xf32> to vector<8x1xf32>
    %cst_8 = arith.constant 9.99999996E-13 : f32
    %cst_9 = arith.constant 9.99999995E+11 : f32
    %9 = vector.broadcast %cst_8 : f32 to vector<8x1xf32>
    %10 = arith.maximumf %9, %8 : vector<8x1xf32>
    %11 = vector.broadcast %cst_9 : f32 to vector<8x1xf32>
    %12 = arith.minimumf %11, %10 : vector<8x1xf32>
    %13 = vector.shape_cast %12 : vector<8x1xf32> to vector<1x8x1xf32>
    %cst_10 = arith.constant dense<0.000000e+00> : vector<1xf32>
    %14 = vector.multi_reduction <add>, %13, %cst_10 [1, 2] : vector<1x8x1xf32> to vector<1xf32>
    %15 = vector.shape_cast %14 : vector<1xf32> to vector<1x1x1xf32>
    %16 = vector.extract %15[0, 0, 0] : f32 from vector<1x1x1xf32>
    %17 = vector.broadcast %16 : f32 to vector<1x8x128xf32>
    %c0_11 = arith.constant 0 : index
    %c0_12 = arith.constant 0 : index
    %c0_13 = arith.constant 0 : index
    %18 = vector.load %arg4[%c0_11, %c0_12, %c0_13] : memref<1x8x128xf32, #tpu.memory_space<vmem>>, vector<1x8x128xf32>
    tpu.vector_store %arg4[%c0_11, %c0_12, %c0_13], %17 {strides = array<i32>} : memref<1x8x128xf32, #tpu.memory_space<vmem>>, vector<1x8x128xf32>,
    return
  }
  func.func @transform_0(%arg0: i32, %arg1: memref<32xi32, #tpu.memory_space<smem>>) -> (i32, i32) {
    %c0_i32 = arith.constant 0 : i32
    %c0_i32_0 = arith.constant 0 : i32
    return %arg0, %c0_i32 : i32, i32
  }
  func.func @transform_2(%arg0: i32, %arg1: memref<32xi32, #tpu.memory_space<smem>>) -> (i32, i32, i32) {
    %c0_i32 = arith.constant 0 : i32
    %c0_i32_0 = arith.constant 0 : i32
    %c0_i32_1 = arith.constant 0 : i32
    return %arg0, %c0_i32, %c0_i32_0 : i32, i32, i32
  }
}

</mosaic_0001>

<bundles_post_ra>
// kernel: tpu_custom_call.1
= control target key start
LH: loop header
LB: loop body
LE: loop exit
PB: predicated region body
PF: predicated region fallthrough
CT: control target
= control target key end

     0   :  { %s751_s0 = inlined_call_operand.hbm [shape: s32[32], index: 0, kind: input, shape index: {}]   ;;  %s752_s1 = inlined_call_operand.hbm [shape: f32[32,32], index: 1, kind: input, shape index: {}]   ;;  %s753_s2 = inlined_call_operand.hbm [shape: f32[10,32], index: 2, kind: input, shape index: {}]   ;;  %s754_s3 = inlined_call_operand.hbm [shape: f32[4,8,128], index: 3, kind: output, shape index: {}]  }
   0x1   :  { %s375_s14 = scalar_lea.hbm %s751_s0, 16 }
   0x2   :  { %p376_p0 = scmp.ne.s32.totalorder %s751_s0, %s375_s14  ;;  %p379_p1 = scmp.lt.u32.totalorder %s375_s14, %s751_s0 }
   0x4   :  { %p381_p2 = pnand %p379_p1, %p376_p0 }
   0x6   :  { %384 = shalt.err (!%p381_p2)  }
   0x7   :  { %s527_s19 = smov [#allocation5]  }
   0x8   :  { %9 = dma.hbm_to_smem %s751_s0, 16, %s527_s19, [#allocation4] }
   0x9   :  { %491 = dma.done.wait [#allocation4], 16 }
   0xa   :  { %492 = vsyncadd [#allocation4], 4294967280 }
   0xb   :  { %11 = sfence }
   0xc   :  { %12 = vsyncpa [#allocation7], 0 }
   0xd   :  { %14 = vsyncpa [#allocation7 + $0x1], 0 }
   0xe   :  { %15 = vsyncpa [#allocation8], 0 }
   0xf   :  { %17 = vsyncpa [#allocation8 + $0x1], 0  ;;  %s563_s22 = smov 0   ;;  %s565_s23 = smov 0  }
  0x10   :  { %s567_s24 = smov 0   ;;  %s569_s25 = smov 0  }
  0x11 LB: > { %s584_s0 = sadd.s32 4294967295, %s517_s25   ;;  %s295_s26 = sadd.s32 4294967294, %s517_s25   ;;  %s517_s25 = sphi %s569_s25, %s768_s25   ;;  %s513_s24 = sphi %s567_s24, %s767_s24   ;;  %s509_s23 = sphi %s565_s23, %s766_s23   ;;  %s505_s22 = sphi %s563_s22, %s765_s22  }
  0x12   : > { %s588_s27 = sadd.s32 1, %s517_s25   ;;  %s30_s28 = sadd.s32 1, %s513_s24 }
  0x13   : > { %s27_s29 = ssub.s32 %s517_s25, %s588_s27  ;;  %p37_p3 = scmp.ne.s32.totalorder %s513_s24, %s509_s23 }
  0x14   : > { %p28_p4 = scmp.eq.s32.totalorder %s27_s29, 0  ;;  %p38_p5 = scmp.eq.s32.totalorder %s517_s25, 0 }
  0x15   : > { %p43_p6 = scmp.ne.s32.totalorder %s509_s23, %s505_s22  ;;  %p44_p7 = scmp.eq.s32.totalorder %s584_s0, 0 }
  0x16   : > { %s600_s30 = scalar_select %p28_p4, %s513_s24, %s30_s28  }
  0x17   : > { %p602_p8 = por %p38_p5, %p37_p3  ;;  %p606_p9 = por %p44_p7, %p43_p6 }
  0x18   : > { %p67_p10 = scmp.eq.s32.totalorder %s584_s0, 3  ;;  %p73_p11 = scmp.eq.s32.totalorder %s295_s26, 3 }
  0x19   : > { %p324_p12 = scmp.lt.s32.totalorder %s517_s25, 4  ;;  %s93_s8 = sand.u32 1, %s513_s24  }
  0x1a   : > { %p612_p13 = por %p67_p10, %p37_p3  ;;  %p616_p0 = por %p73_p11, %p43_p6 }
  0x1b   : > { %s299_s9 = sshll.u32 %s517_s25, 7  ;;  %s298_s10 = sshll.u32 %s93_s8, 3 }
  0x1c   : > { %s758_s6 = scalar_select %p612_p13, 1, 0 }
  0x1d   : > { %s759_s7 = scalar_select %p616_p0, 1, 0 }
  0x1e   : > { %s625_s13 = scalar_lea.hbm %s752_s1, %s299_s9  ;;  %s97_s14 = scalar_lea.vmem [#allocation6], %s298_s10 }
  0x1f   : > { %s104_s15 = sshll.u32 %s97_s14, 4  ;;  %p629_p1 = pnand %p324_p12, %p602_p8  ;;  %s633_s15 = int_to_ptr.vmem [resolvable:$true] %s104_s15 }
  0x20   : > { %s94_s17 = scalar_lea.sflag [#allocation7], %s93_s8  ;;  %s385_s18 = scalar_lea.hbm %s625_s13, 128 }
  0x21   : > { %p386_p4 = scmp.ne.s32.totalorder %s625_s13, %s385_s18  ;;  %p387_p5 = pneg %p629_p1 }
  0x22   : > { %s390_s21 = scalar_lea.hbm %s752_s1, 512  ;;  %p391_p8 = scmp.lt.u32.totalorder %s625_s13, %s752_s1 }
  0x23   : > { %p388_p6 = pnand %p387_p5, %p386_p4  ;;  %p392_p10 = scmp.lt.u32.totalorder %s390_s21, %s385_s18 }
  0x24   : > { %p394_p12 = scmp.lt.u32.totalorder %s385_s18, %s625_s13 }
  0x25   : > { %p389_p7 = pneg %p388_p6  ;;  %p393_p11 = por %p392_p10, %p391_p8 }
  0x27   : > { %p395_p2 = por %p394_p12, %p393_p11 }
  0x29   : > { %p396_p3 = pnand %p395_p2, %p389_p7 }
  0x2b   : > { %399 = shalt.err (!%p396_p3)
}
  0x2c   : > { %s400_s29 = scalar_lea.vmem %s633_s15, 128  ;;  %s528_s4 = smov [#allocation6]  }
  0x2d   : > { %p401_p4 = scmp.ne.s32.totalorder %s633_s15, %s400_s29  ;;  %s405_s8 = sshll.u32 %s528_s4, 4  ;;  %s406_s8 = int_to_ptr.vmem [resolvable:$false] %s405_s8 }
  0x2e   : > { %s407_s9 = scalar_lea.vmem %s406_s8, 256  ;;  %p408_p13 = scmp.lt.s32.totalorder %s633_s15, %s406_s8 }
  0x2f   : > { %p403_p6 = pnand %p401_p4, %p387_p5  ;;  %p409_p8 = scmp.lt.s32.totalorder %s407_s9, %s400_s29 }
  0x31   : > { %p404_p0 = pneg %p403_p6  ;;  %p410_p10 = por %p409_p8, %p408_p13 }
  0x33   : > { %p411_p11 = pnand %p410_p10, %p404_p0 }
  0x35   : > { %414 = shalt.err (!%p411_p11)
}
  0x36   : > { %319 = dma.hbm_to_vmem [thread:$0]  (!%p629_p1), %s625_s13, 128, %s633_s15, %s94_s17  }
  0x37   : > { %p761_p2 = scmp.lt.s32.totalorder %s517_s25, 5  ;;  %p762_p3 = scmp.ge.s32.totalorder %s517_s25, 1 }
  0x39   : > { %p110_p5 = pnand %p762_p3, %p761_p2 }
  0x3a   : > { %s667_s10 = sand.u32 (!%p110_p5), 1, %s509_s23  }
  0x3b   : > { %113 = sbr.rel (%p110_p5) target bundleno = 484 (0x1e4), region = 24  ;;  %s301_s11 = sshll.u32 (!%p110_p5), %s667_s10, 3 }
  0x3c   : > { %s116_s12 = scalar_lea.sflag (!%p110_p5), [#allocation7], %s667_s10  ;;  %s671_s14 = scalar_lea.vmem (!%p110_p5), [#allocation6], %s301_s11 }
  0x42   : > { %494 = dma.done.wait (%p606_p9), %s116_s12, 128  }
  0x43   : > { %496 = vsyncadd (%p606_p9), %s116_s12, 4294967168  ;;  %s303_s13 = sshll.u32 %s584_s0, 3  ;;  %s678_s15 = scalar_lea.vmem [#allocation9], %s301_s11 }
  0x44   : > { %s680_s16 = smov 0  }
  0x45 LB: >> { %s145_s17 = sadd.s32 %s521_s16, %s303_s13  ;;  %s149_s19 = scalar_lea.vmem [#allocation2], %s521_s16  ;;  %s521_s16 = sphi %s680_s16, %s144_s16  }
  0x46   : >> { %s146_s18 = sld [smem:[#allocation5 + %s145_s17]]  ;;  %s157_s5 = sshll.u32 %s149_s19, 4  ;;  %s158_s5 = int_to_ptr.vmem [resolvable:$true] %s157_s5 }
  0x47   : >> { %s417_s9 = scalar_lea.hbm %s753_s2, 256 }
  0x4c   : >> { %s304_s20 = sshll.u32 %s146_s18, 4 }
  0x4d   : >> { %s148_s28 = scalar_lea.hbm %s753_s2, %s304_s20 }
  0x4e   : >> { %s415_s29 = scalar_lea.hbm %s148_s28, 16  ;;  %p418_p13 = scmp.lt.u32.totalorder %s148_s28, %s753_s2 }
  0x4f   : >> { %p416_p9 = scmp.ne.s32.totalorder %s148_s28, %s415_s29  ;;  %p419_p0 = scmp.lt.u32.totalorder %s417_s9, %s415_s29 }
  0x50   : >> { %p421_p7 = scmp.lt.u32.totalorder %s415_s29, %s148_s28 }
  0x51   : >> { %p420_p1 = por %p419_p0, %p418_p13 }
  0x53   : >> { %p422_p12 = por %p421_p7, %p420_p1 }
  0x55   : >> { %p423_p4 = pnand %p422_p12, %p416_p9 }
  0x57   : >> { %426 = shalt.err (!%p423_p4)  }
  0x58   : >> { %s427_s17 = scalar_lea.vmem %s158_s5, 16  ;;  %s529_s18 = smov [#allocation2]  }
  0x59   : >> { %p428_p6 = scmp.ne.s32.totalorder %s158_s5, %s427_s17  ;;  %s429_s19 = sshll.u32 %s529_s18, 4  ;;  %s430_s19 = int_to_ptr.vmem [resolvable:$false] %s429_s19 }
  0x5a   : >> { %s431_s20 = scalar_lea.vmem %s430_s19, 128  ;;  %p432_p8 = scmp.lt.s32.totalorder %s158_s5, %s430_s19 }
  0x5b   : >> { %p433_p10 = scmp.lt.s32.totalorder %s431_s20, %s427_s17 }
  0x5d   : >> { %p434_p11 = por %p433_p10, %p432_p8 }
  0x5f   : >> { %p435_p2 = pnand %p434_p11, %p428_p6 }
  0x61   : >> { %438 = shalt.err (!%p435_p2)  }
  0x62   : >> { %160 = dma.hbm_to_vmem [thread:$0]  %s148_s28, 16, %s158_s5, [#allocation3] }
  0x63   : >> { %s144_s16 = sadd.s32 1, %s521_s16  }
  0x64   : >> { %p141_p3 = scmp.ge.s32.totalorder %s144_s16, 8  }
  0x65   : > { %s523_s21 = smov (%p141_p3), 0  }
  0x66   : > { %143 = sbr.rel (!%p141_p3) target bundleno = 69 (0x45), region = 89 }
  0x6d LB: >> { %497 = dma.done.wait [#allocation3], 16  ;;  %s525_s21 = sphi %s523_s21, %s166_s21  }
  0x6e   : >> { %498 = vsyncadd [#allocation3], 4294967280  ;;  %s166_s21 = sadd.s32 1, %s525_s21  }
  0x6f   : >> { %p163_p5 = scmp.ge.s32.totalorder %s166_s21, 8  }
  0x70   : > { %v169_v0 = vld [vmem:[%s671_s14] sm:$0xff] (%p163_p5)  ;;  %v170_v1 = vld [vmem:[#allocation2] sm:$0xff] (%p163_p5)  ;;  %vm173_vm0 = vcmask (%p163_p5), 261120   ;;  %vm179_vm1 = vcmask (%p163_p5), 7168   ;;  %s306_s14 = sshll.u32 (%p163_p5), %s584_s0, 7  ;;  %s206_s13 = sshll.u32 (%p163_p5), %s678_s15, 4  ;;  %s709_s13 = int_to_ptr.vmem [resolvable:$true] %s206_s13 }
  0x71   : > { %165 = sbr.rel (!%p163_p5) target bundleno = 109 (0x6d), region = 100  ;;  %v171_v2 = vsub.f32 (%p163_p5), %v169_v0, %v170_v1  ;;  %s707_s26 = scalar_lea.hbm (%p163_p5), %s754_s3, %s306_s14 }
  0x72   : > { %s193_s29 = scalar_lea.sflag (%p163_p5), [#allocation8], %s667_s10  ;;  %s439_s4 = scalar_lea.vmem (%p163_p5), %s709_s13, 128 }
  0x73   : > { %v172_v3 = vmul.f32 (%p163_p5), %v171_v2, %v171_v2  ;;  %p440_p9 = scmp.ne.s32.totalorder (%p163_p5), %s709_s13, %s439_s4  ;;  %p763_p13 = scmp.ne.s32.totalorder (%p163_p5), %s758_s6, 0 }
  0x74   : > { %s530_s0 = smov (%p163_p5), [#allocation9]  }
  0x75   : > { %v174_v4 = vsel (%p163_p5), %vm173_vm0, %v172_v3, 0.0  ;;  %p441_p0 = pnand (%p163_p5), %p440_p9, %p763_p13  ;;  %s443_s8 = sshll.u32 (%p163_p5), %s530_s0, 4  ;;  %s444_s8 = int_to_ptr.vmem [resolvable:$false] %s443_s8 }
  0x76   : > { %175 = vadd.xlane.f32.xlu0 (%p163_p5), %v174_v4  ;;  %s445_s9 = scalar_lea.vmem (%p163_p5), %s444_s8, 256  ;;  %p446_p7 = scmp.lt.s32.totalorder (%p163_p5), %s709_s13, %s444_s8 }
  0x77   : > { %p442_p1 = pneg (%p163_p5), %p441_p0  ;;  %p447_p12 = scmp.lt.s32.totalorder (%p163_p5), %s445_s9, %s439_s4 }
  0x79   : > { %p448_p4 = por %p447_p12, %p446_p7 }
  0x7b   : > { %p449_p6 = pnand %p448_p4, %p442_p1 }
 0x103   : > { %v176_v5 = vpop.xlane.xlu0 %175 }
 0x104   : > { %v177_v6 = vmax.f32 %v176_v5, 1e-12 }
 0x106   : > { %v178_v7 = vmin.f32 %v177_v6, 1e+12 }
 0x108   : > { %v180_v8 = vsel %vm179_vm1, %v178_v7, 0.0 }
 0x109   : > { %181 = vadd.xlane.f32.xlu0 %v180_v8 }
 0x196   : > { %v182_v9 = vpop.xlane.xlu0 %181 }
 0x197   : > { %v183_v10 = vrot.slane %v182_v9, 4 }
 0x199   : > { %v184_v11 = vadd.f32 %v183_v10, %v182_v9 }
 0x19b   : > { %v185_v12 = vrot.slane %v184_v11, 2 }
 0x19d   : > { %v186_v13 = vadd.f32 %v185_v12, %v184_v11 }
 0x19f   : > { %v187_v14 = vrot.slane %v186_v13, 1 }
 0x1a1   : > { %v188_v15 = vadd.f32 %v187_v14, %v186_v13 }
 0x1a3   : > { %310 = vpush %v188_v15 }
 0x1d4   : > { %s311_s28 = spop %310 }
 0x1d5   : > { %v190_v16 = vstv %s311_s28 }
 0x1d6   : > { %191 = vst [vmem:[%s678_s15] sm:$0xff] %v190_v16 }
 0x1d7   : > { %452 = shalt.err (!%p449_p6)
}
 0x1d8   : > { %s453_s10 = scalar_lea.hbm %s707_s26, 128  ;;  %s457_s12 = scalar_lea.hbm %s754_s3, 512 }
 0x1d9   : > { %p454_p8 = scmp.ne.s32.totalorder %s707_s26, %s453_s10  ;;  %p458_p2 = scmp.lt.u32.totalorder %s707_s26, %s754_s3 }
 0x1da   : > { %p459_p3 = scmp.lt.u32.totalorder %s457_s12, %s453_s10  ;;  %p461_p9 = scmp.lt.u32.totalorder %s453_s10, %s707_s26 }
 0x1db   : > { %p455_p10 = pnand %p454_p8, %p763_p13 }
 0x1dc   : > { %p460_p5 = por %p459_p3, %p458_p2 }
 0x1dd   : > { %p456_p11 = pneg %p455_p10 }
 0x1de   : > { %p462_p0 = por %p461_p9, %p460_p5 }
 0x1e0   : > { %p463_p1 = pnand %p462_p0, %p456_p11 }
 0x1e2   : > { %466 = shalt.err (!%p463_p1)
}
 0x1e3   : > { %314 = dma.vmem_to_hbm [thread:$0]  (%p763_p13), %s709_s13, 128, %s707_s26, %s193_s29  }
 0x1e4 PF: > { %p325_p7 = scmp.ge.s32.totalorder %s517_s25, 2  ;;  %s218_s19 = sand.u32 1, %s505_s22  }
 0x1e5   : > { %p764_p12 = scmp.ne.s32.totalorder %s759_s7, 0  ;;  %s219_s20 = scalar_lea.sflag [#allocation8], %s218_s19 }
 0x1e7   : > { %p321_p4 = pnand %p325_p7, %p764_p12 }
 0x1e9   : > { %500 = dma.done.wait (!%p321_p4), %s219_s20, 128  }
 0x1ea   : > { %502 = vsyncadd (!%p321_p4), %s219_s20, 4294967168  ;;  %p20_p6 = scmp.ge.s32.totalorder %s588_s27, 6   ;;  %s765_s22 = smov %s509_s23 }
 0x1eb   : > { %s766_s23 = smov %s513_s24  ;;  %s767_s24 = smov %s600_s30 }
 0x1ec   : > { %s768_s25 = smov %s588_s27  ;;  %22 = sbr.rel (!%p20_p6) target bundleno = 17 (0x11), region = 111 }
 0x1f3   :  { %224 = vsyncpa [#allocation7], 1 }
 0x1f4   :  { %226 = vsyncpa [#allocation7 + $0x1], 1 }
 0x1f5   :  { %227 = vsyncpa [#allocation8], 1 }
 0x1f6   :  { %229 = vsyncpa [#allocation8 + $0x1], 1 }
 0x1f7   :  { %230 = vsyncmov [#allocation3] }
 0x1fa   :  { %s231_s25 = vpop.sfrf %230 }
 0x1fb   :  { %p309_p13 = scmp.ne.s32.totalorder %s231_s25, 0 }
 0x1fd   :  { %235 = shalt.err (%p309_p13)  }

</bundles_post_ra>
